<compile_context>
chip_gen: v7x
topology: tpu7x:2x2x1
jax: 0.10.0
libtpu: 0.0.40
codegen_flags: <defaults>
</compile_context>

<pallas_src>
import math
from dataclasses import dataclass
from functools import partial

import jax
import jax.numpy as jnp
import numpy as np
from jax import lax
from jax.experimental import pallas as pl
from jax.experimental.pallas import tpu as pltpu

EPS = 1e-8
_F32 = jnp.float32
_BF16 = jnp.bfloat16


@dataclass
class GPTConfig:
    dim: int
    num_heads: int = 8
    num_layers: int = 12
    norm_type: str = "rms"
    num_kv_heads: int = 2
    dropout: float = 0.2
    max_seq_length: int = 1024
    vocab_size: int = 50257


# ----------------------------- helpers ---------------------------------------

_VMEM_LIMIT = None


def _vmem_limit_bytes():
    """Generation-aware scoped-VMEM limit (don't cap v5e/v6e at 48 MiB, stay
    conservative on v7x's 64 MiB core)."""
    global _VMEM_LIMIT
    if _VMEM_LIMIT is not None:
        return _VMEM_LIMIT
    limit = 48 * 1024 * 1024                      # safe fallback on every gen
    try:
        cap = getattr(pltpu.get_tpu_info(), "vmem_capacity_bytes", None)
        if cap and cap >= 100 * 1024 * 1024:      # v5e / v6e: 128 MiB physical
            limit = 100 * 1024 * 1024
        elif cap and cap > 16 * 1024 * 1024:      # v7x: 64 MiB physical
            limit = min(cap - 8 * 1024 * 1024, 56 * 1024 * 1024)
    except Exception:
        pass
    _VMEM_LIMIT = limit
    return limit


def _ceil_to(x, m):
    return ((x + m - 1) // m) * m


def _seq_tile(T):
    """Query/row tile size that divides T and respects the (8,128) rule; grows
    to 512 when the VMEM budget allows (v5e/v6e)."""
    if T <= 128:
        return T
    big = _vmem_limit_bytes() >= 96 * 1024 * 1024
    for t in ((512, 256, 128) if big else (256, 128)):
        if T % t == 0:
            return t
    return T


def _vocab_tiles(V):
    tV = 1024 if V >= 1024 else _ceil_to(V, 128)
    return tV, _ceil_to(V, tV)


def _rmsnorm(x, g, eps):
    # matches the PyTorch reference: x / (||x||_2 + eps) * scale  (no 1/sqrt(dim))
    nrm = jnp.sqrt(jnp.sum(x * x, axis=-1, keepdims=True))
    return x / (nrm + eps) * g


def rotary_tables(T, hd):
    inv_freq = 1.0 / (10000.0 ** (jnp.arange(0, hd, 2, dtype=_F32) / hd))
    freqs = jnp.arange(T, dtype=_F32)[:, None] * inv_freq[None, :]
    return jnp.cos(freqs), jnp.sin(freqs)          # (T, hd//2) each


# ----------------------------- kernels ---------------------------------------


def _kv_kernel(x_ref, g1_ref, wk_ref, bk_ref, wv_ref, bv_ref, cos_ref, sin_ref,
               k_ref, v_ref, *, KVH, hd, eps):
    """Per (batch, row-tile): K projection + rotary (pure lane math) and V
    projection.  Rotated K / V are emitted in bf16 with lane-dense stores."""
    half = hd // 2
    x = x_ref[0]                                              # (tq, C) f32
    h = _rmsnorm(x, g1_ref[...], eps)
    hb = h.astype(_BF16)
    k = jnp.dot(hb, wk_ref[...], preferred_element_type=_F32) + bk_ref[...]
    v = jnp.dot(hb, wv_ref[...], preferred_element_type=_F32) + bv_ref[...]
    cos = cos_ref[...]                                        # (tq, half)
    sin = sin_ref[...]
    # wk columns are pre-de-interleaved per head: [even lanes | odd lanes]
    parts = []
    for g in range(KVH):
        a = k[:, g * hd:g * hd + half]
        b = k[:, g * hd + half:(g + 1) * hd]
        parts.append(a * cos - b * sin)
        parts.append(a * sin - b * cos)   # matches the torch apply_rotary sign
    k_ref[0] = jnp.concatenate(parts, axis=-1).astype(k_ref.dtype)
    v_ref[0] = v.astype(v_ref.dtype)


def _block_kernel(x_ref, k_ref, v_ref, g1_ref, wq_ref, bq_ref, wo_ref, bo_ref,
                  g2_ref, wpa_ref, bpa_ref, wpg_ref, bpg_ref, w2_ref, b2_ref,
                  cos_ref, sin_ref, o_ref,
                  *, H, KVH, hd, tq, tk, inv_scale, eps):
    """Per (batch, query-tile): flash-style causal MQA (bf16 K/V, online softmax
    over key tiles 0..qi) + fused output projection + SwiGLU FFN."""
    half = hd // 2
    rep = H // KVH
    qi = pl.program_id(1)

    x = x_ref[0]                                              # (tq, C)  f32

    # ---- attention: Q projection + per-head rotary in registers ------------
    h = _rmsnorm(x, g1_ref[...], eps)
    q = jnp.dot(h.astype(_BF16), wq_ref[...],
                preferred_element_type=_F32) + bq_ref[...]
    cos = cos_ref[...]                                        # (tq, half)
    sin = sin_ref[...]
    q_rot = []
    for head in range(H):
        a = q[:, head * hd:head * hd + half]
        b = q[:, head * hd + half:(head + 1) * hd]
        q_rot.append(jnp.concatenate([a * cos - b * sin, a * sin - b * cos],
                                     axis=-1).astype(_BF16))

    inv_sqrt_hd = jnp.float32(1.0 / math.sqrt(hd))
    neg_big = jnp.float32(-1e30)
    row_ids = qi * tq + lax.broadcasted_iota(jnp.int32, (tq, tk), 0)

    ctx_parts = [None] * H
    for g in range(KVH):                      # one kv-tile walk per KV head:
        m0 = jnp.full((tq, 1), -jnp.inf, _F32)    # k/v tile loaded once, reused
        l0 = jnp.zeros((tq, 1), _F32)             # by the `rep` query heads
        a0 = jnp.zeros((tq, hd), _F32)
        carry0 = ((m0,) * rep, (l0,) * rep, (a0,) * rep)

        def body(j, carry, g=g):
            ms, ls, accs = carry
            start = pl.multiple_of(j * tk, tk)
            kt = k_ref[0, pl.ds(start, tk), g * hd:(g + 1) * hd]   # (tk, hd) bf16
            vt = v_ref[0, pl.ds(start, tk), g * hd:(g + 1) * hd]   # (tk, hd) bf16
            col_ids = start + lax.broadcasted_iota(jnp.int32, (tq, tk), 1)
            mask = row_ids >= col_ids
            nm, nl, na = [], [], []
            for r in range(rep):
                s = lax.dot_general(q_rot[g * rep + r], kt,
                                    (((1,), (1,)), ((), ())),
                                    preferred_element_type=_F32) * inv_sqrt_hd
                s = jnp.where(mask, s, neg_big)
                m_new = jnp.maximum(ms[r], jnp.max(s, axis=-1, keepdims=True))
                alpha = jnp.exp(ms[r] - m_new)
                p = jnp.exp(s - m_new)
                nl.append(alpha * ls[r] + jnp.sum(p, axis=-1, keepdims=True))
                na.append(alpha * accs[r] + jnp.dot(p.astype(_BF16), vt,
                                                    preferred_element_type=_F32))
                nm.append(m_new)
            return tuple(nm), tuple(nl), tuple(na)

        # causal skip: only kv tiles 0..qi carry unmasked keys (tk == tq)
        _, ls, accs = lax.fori_loop(0, qi + 1, body, carry0)
        for r in range(rep):
            head = g * rep + r
            ctx_parts[head] = (accs[r] *
                               pl.reciprocal(ls[r], approx=True)).astype(_BF16)

    # fused output projection: single (tq, C) x (C, C) MXU matmul
    ctx = jnp.concatenate(ctx_parts, axis=-1)                 # (tq, C) bf16
    attn_out = jnp.dot(ctx, wo_ref[...],
                       preferred_element_type=_F32) + bo_ref[...]
    x = x + attn_out * inv_scale

    # ---- feed-forward branch (SwiGLU -> Linear) -----------------------------
    h2 = _rmsnorm(x, g2_ref[...], eps)
    h2b = h2.astype(_BF16)
    xp = jnp.dot(h2b, wpa_ref[...], preferred_element_type=_F32) + bpa_ref[...]
    gate = jnp.dot(h2b, wpg_ref[...], preferred_element_type=_F32) + bpg_ref[...]
    sw = xp * (gate * (1.0 / (1.0 + jnp.exp(-gate))))          # silu
    ffn = jnp.dot(sw.astype(_BF16), w2_ref[...],
                  preferred_element_type=_F32) + b2_ref[...]
    o_ref[0] = x + ffn * inv_scale


def _final_norm_kernel(x_ref, g_ref, o_ref, *, eps):
    o_ref[0] = _rmsnorm(x_ref[0], g_ref[...], eps).astype(o_ref.dtype)


def _lmhead_kernel(x_ref, w_ref, o_ref):
    o_ref[0] = jnp.dot(x_ref[0], w_ref[...], preferred_element_type=_F32)


# ----------------------------- wrappers ---------------------------------------


def run_kv(x, lp, cos, sin, cfg):
    B, T, C = x.shape
    hd = C // cfg.num_heads
    half = hd // 2
    KVC = hd * cfg.num_kv_heads
    tq = _seq_tile(T)
    grid = (B, T // tq)
    kernel = partial(_kv_kernel, KVH=cfg.num_kv_heads, hd=hd, eps=EPS)
    in_specs = [
        pl.BlockSpec((1, tq, C), lambda b, ti: (b, ti, 0)),
        pl.BlockSpec(lp["g1"].shape, lambda b, ti: (0, 0)),
        pl.BlockSpec(lp["wk"].shape, lambda b, ti: (0, 0)),
        pl.BlockSpec(lp["bk"].shape, lambda b, ti: (0, 0)),
        pl.BlockSpec(lp["wv"].shape, lambda b, ti: (0, 0)),
        pl.BlockSpec(lp["bv"].shape, lambda b, ti: (0, 0)),
        pl.BlockSpec((tq, half), lambda b, ti: (ti, 0)),
        pl.BlockSpec((tq, half), lambda b, ti: (ti, 0)),
    ]
    return pl.pallas_call(
        kernel,
        grid=grid,
        in_specs=in_specs,
        out_specs=(pl.BlockSpec((1, tq, KVC), lambda b, ti: (b, ti, 0)),
                   pl.BlockSpec((1, tq, KVC), lambda b, ti: (b, ti, 0))),
        out_shape=(jax.ShapeDtypeStruct((B, T, KVC), jnp.bfloat16),
                   jax.ShapeDtypeStruct((B, T, KVC), jnp.bfloat16)),
        compiler_params=pltpu.CompilerParams(
            dimension_semantics=("parallel", "parallel"),
            vmem_limit_bytes=_vmem_limit_bytes()),
    )(x, lp["g1"], lp["wk"], lp["bk"], lp["wv"], lp["bv"], cos, sin)


def run_block(x, k_rot, v, lp, cos, sin, cfg):
    B, T, C = x.shape
    hd = C // cfg.num_heads
    half = hd // 2
    KVC = hd * cfg.num_kv_heads
    tq = _seq_tile(T)
    tk = tq                         # flash kv tile == query tile (qi+1 tiles walked)
    grid = (B, T // tq)
    kernel = partial(_block_kernel, H=cfg.num_heads, KVH=cfg.num_kv_heads,
                     hd=hd, tq=tq, tk=tk,
                     inv_scale=1.0 / math.sqrt(2 * cfg.num_layers), eps=EPS)
    w_names = ["g1", "wq", "bq", "wo", "bo", "g2",
               "wpa", "bpa", "wpg", "bpg", "w2", "b2"]
    w_args = [lp[n] for n in w_names]
    w_specs = [pl.BlockSpec(a.shape, lambda b, qi: (0, 0)) for a in w_args]
    in_specs = ([pl.BlockSpec((1, tq, C), lambda b, qi: (b, qi, 0)),
                 pl.BlockSpec((1, T, KVC), lambda b, qi: (b, 0, 0)),
                 pl.BlockSpec((1, T, KVC), lambda b, qi: (b, 0, 0))]
                + w_specs
                + [pl.BlockSpec((tq, half), lambda b, qi: (qi, 0)),
                   pl.BlockSpec((tq, half), lambda b, qi: (qi, 0))])
    return pl.pallas_call(
        kernel,
        grid=grid,
        in_specs=in_specs,
        out_specs=pl.BlockSpec((1, tq, C), lambda b, qi: (b, qi, 0)),
        out_shape=jax.ShapeDtypeStruct((B, T, C), jnp.float32),
        compiler_params=pltpu.CompilerParams(
            dimension_semantics=("parallel", "parallel"),
            vmem_limit_bytes=_vmem_limit_bytes()),
    )(x, k_rot, v, *w_args, cos, sin)


def run_final(x, gf, w_lm, vocab_size):
    B, T, C = x.shape
    Vp = w_lm.shape[1]
    tT = _seq_tile(T)
    tV, _ = _vocab_tiles(vocab_size)

    # final RMSNorm hoisted out of the vocab loop (one pass per row tile, bf16 out)
    xn = pl.pallas_call(
        partial(_final_norm_kernel, eps=EPS),
        grid=(B, T // tT),
        in_specs=[pl.BlockSpec((1, tT, C), lambda b, ti: (b, ti, 0)),
                  pl.BlockSpec((1, C), lambda b, ti: (0, 0))],
        out_specs=pl.BlockSpec((1, tT, C), lambda b, ti: (b, ti, 0)),
        out_shape=jax.ShapeDtypeStruct((B, T, C), jnp.bfloat16),
        compiler_params=pltpu.CompilerParams(
            dimension_semantics=("parallel", "parallel"),
            vmem_limit_bytes=_vmem_limit_bytes()),
    )(x, gf)

    # vocab axis outermost: each (C, tV) tile of the tied embedding streams from
    # HBM once (block index unchanged across the inner batch/row iterations).
    out = pl.pallas_call(
        _lmhead_kernel,
        grid=(Vp // tV, B, T // tT),
        in_specs=[pl.BlockSpec((1, tT, C), lambda vi, b, ti: (b, ti, 0)),
                  pl.BlockSpec((C, tV), lambda vi, b, ti: (0, vi))],
        out_specs=pl.BlockSpec((1, tT, tV), lambda vi, b, ti: (b, ti, vi)),
        out_shape=jax.ShapeDtypeStruct((B, T, Vp), jnp.float32),
        compiler_params=pltpu.CompilerParams(
            dimension_semantics=("parallel", "parallel", "parallel"),
            vmem_limit_bytes=_vmem_limit_bytes()),
    )(xn, w_lm)
    return out[:, :, :vocab_size]


def trial_gpt_forward(idx, kparams, cfg):
    B, T = idx.shape
    assert T <= cfg.max_seq_length
    hd = cfg.dim // cfg.num_heads
    x = jnp.take(kparams["embed"], idx, axis=0)          # glue: embedding gather
    cos, sin = rotary_tables(T, hd)
    for lp in kparams["layers"]:
        k_rot, v = run_kv(x, lp, cos, sin, cfg)
        x = run_block(x, k_rot, v, lp, cos, sin, cfg)
    return run_final(x, kparams["gf"], kparams["w_lm"], cfg.vocab_size)


# ----------------------------- params ------------------------------------------


def init_params(key, cfg):
    """Original-layout f32 params (what the PyTorch module would hold)."""
    hd = cfg.dim // cfg.num_heads
    kv_dim = hd * cfg.num_kv_heads
    keys = jax.random.split(key, 1 + cfg.num_layers)

    def w(k, shape):
        return 0.02 * jax.random.normal(k, shape, jnp.float32)

    params = {
        "embed": w(keys[0], (cfg.vocab_size, cfg.dim)),
        "gf": jnp.ones((1, cfg.dim), jnp.float32),
        "layers": [],
    }
    for l in range(cfg.num_layers):
        lk = jax.random.split(keys[1 + l], 16)
        params["layers"].append(dict(
            g1=jnp.ones((1, cfg.dim), jnp.float32),
            wq=w(lk[0], (cfg.dim, cfg.dim)),   bq=w(lk[1], (1, cfg.dim)),
            wk=w(lk[2], (cfg.dim, kv_dim)),    bk=w(lk[3], (1, kv_dim)),
            wv=w(lk[4], (cfg.dim, kv_dim)),    bv=w(lk[5], (1, kv_dim)),
            wo=w(lk[6], (cfg.dim, cfg.dim)),   bo=w(lk[7], (1, cfg.dim)),
            g2=jnp.ones((1, cfg.dim), jnp.float32),
            wpa=w(lk[8], (cfg.dim, cfg.dim)),  bpa=w(lk[9], (1, cfg.dim)),
            wpg=w(lk[10], (cfg.dim, cfg.dim)), bpg=w(lk[11], (1, cfg.dim)),
            w2=w(lk[12], (cfg.dim, cfg.dim)),  b2=w(lk[13], (1, cfg.dim)),
        ))
    return params


def prepare_kernel_params(params, cfg):
    """Kernel layout: bf16 weights, de-interleaved q/k columns, padded lm head."""
    hd = cfg.dim // cfg.num_heads
    bf = jnp.bfloat16
    perm = np.concatenate([np.arange(0, hd, 2), np.arange(1, hd, 2)])
    qperm = jnp.asarray(np.concatenate([h * hd + perm for h in range(cfg.num_heads)]))
    kperm = jnp.asarray(np.concatenate([g * hd + perm for g in range(cfg.num_kv_heads)]))
    layers = []
    for lp in params["layers"]:
        layers.append(dict(
            g1=lp["g1"],
            wq=lp["wq"][:, qperm].astype(bf), bq=lp["bq"][:, qperm],
            wk=lp["wk"][:, kperm].astype(bf), bk=lp["bk"][:, kperm],
            wv=lp["wv"].astype(bf),           bv=lp["bv"],
            wo=lp["wo"].astype(bf),           bo=lp["bo"],
            g2=lp["g2"],
            wpa=lp["wpa"].astype(bf), bpa=lp["bpa"],
            wpg=lp["wpg"].astype(bf), bpg=lp["bpg"],
            w2=lp["w2"].astype(bf),   b2=lp["b2"],
        ))
    V, C = params["embed"].shape
    _, Vp = _vocab_tiles(V)
    w_lm = jnp.pad(params["embed"].T.astype(bf), ((0, 0), (0, Vp - V)))
    return dict(embed=params["embed"], gf=params["gf"], w_lm=w_lm, layers=layers)


# ----------------------------- reference ----------------------------------------


def ref_forward(idx, params, cfg):
    """Pure-JAX mirror of the PyTorch forward (eval mode), with the same bf16
    matmul-operand casts as the kernels (f32 accumulation)."""
    eps = 1e-8
    dim, H, KVH = cfg.dim, cfg.num_heads, cfg.num_kv_heads
    hd, rep = dim // H, H // KVH
    inv_scale = 1.0 / math.sqrt(2 * cfg.num_layers)
    inv_sqrt_hd = 1.0 / math.sqrt(hd)
    B, T = idx.shape
    bf, f32 = jnp.bfloat16, jnp.float32
    x = params["embed"][idx]

    inv_freq = 1.0 / (10000.0 ** (jnp.arange(0, hd, 2, dtype=f32) / hd))
    freqs = jnp.arange(T, dtype=f32)[:, None] * inv_freq[None, :]
    cos, sin = jnp.cos(freqs), jnp.sin(freqs)

    def rms(z, g):
        n = jnp.sqrt(jnp.sum(z * z, axis=-1, keepdims=True))
        return z / (n + eps) * g

    def bdot(a, w):
        return jnp.dot(a.astype(bf), w.astype(bf), preferred_element_type=f32)

    def rot(z):
        z1, z2 = z[..., ::2], z[..., 1::2]
        return jnp.concatenate([z1 * cos - z2 * sin, z1 * sin - z2 * cos], axis=-1)

    for lp in params["layers"]:
        h = rms(x, lp["g1"])
        q = (bdot(h, lp["wq"]) + lp["bq"]).reshape(B, T, H, hd).transpose(0, 2, 1, 3)
        k = (bdot(h, lp["wk"]) + lp["bk"]).reshape(B, T, KVH, hd).transpose(0, 2, 1, 3)
        v = (bdot(h, lp["wv"]) + lp["bv"]).reshape(B, T, KVH, hd).transpose(0, 2, 1, 3)
        q, k = rot(q), rot(k)
        k = jnp.repeat(k, rep, axis=1)
        v = jnp.repeat(v, rep, axis=1)
        scores = jnp.einsum("bhqd,bhkd->bhqk", q.astype(bf), k.astype(bf),
                            preferred_element_type=f32) * inv_sqrt_hd
        mask = jnp.tril(jnp.ones((T, T)))
        scores = jnp.where(mask == 0, -jnp.inf, scores)
        attn = jax.nn.softmax(scores, axis=-1)
        ctx = jnp.einsum("bhqk,bhkd->bhqd", attn.astype(bf), v.astype(bf),
                         preferred_element_type=f32)
        ctx = ctx.transpose(0, 2, 1, 3).reshape(B, T, dim)
        x = x + (bdot(ctx, lp["wo"]) + lp["bo"]) * inv_scale
        h2 = rms(x, lp["g2"])
        xp = bdot(h2, lp["wpa"]) + lp["bpa"]
        gate = bdot(h2, lp["wpg"]) + lp["bpg"]
        sw = xp * (gate * (1.0 / (1.0 + jnp.exp(-gate))))
        x = x + (bdot(sw, lp["w2"]) + lp["b2"]) * inv_scale
    x = rms(x, params["gf"])
    return bdot(x, params["embed"].T)


# ----------------------------- main ---------------------------------------------


if __name__ == "__main__":
    cfg = GPTConfig(dim=64, num_heads=8, num_layers=2, num_kv_heads=2,
                    vocab_size=128, max_seq_length=64)
    key = jax.random.PRNGKey(0)
    pkey, ikey = jax.random.split(key)
    params = init_params(pkey, cfg)
    kparams = prepare_kernel_params(params, cfg)

    B, T = 2, 8
    idx = jax.random.randint(ikey, (B, T), 0, cfg.vocab_size)

    logits = trial_gpt_forward(idx, kparams, cfg)
    logits = jax.block_until_ready(logits)
    assert logits.shape == (B, T, cfg.vocab_size)

    ref = ref_forward(idx, params, cfg)
    np.testing.assert_allclose(np.asarray(logits), np.asarray(ref), rtol=2e-2, atol=2e-3)
    print("KERNEL_OK")
</pallas_src>

<mosaic_0001>
module attributes {stable_mosaic.version = 11 : i64} {
  func.func @_kv_kernel(%arg0: i32, %arg1: i32, %arg2: memref<1x8x64xf32, #tpu.memory_space<vmem>>, %arg3: memref<1x64xf32, #tpu.memory_space<vmem>>, %arg4: memref<64x16xbf16, #tpu.memory_space<vmem>>, %arg5: memref<1x16xf32, #tpu.memory_space<vmem>>, %arg6: memref<64x16xbf16, #tpu.memory_space<vmem>>, %arg7: memref<1x16xf32, #tpu.memory_space<vmem>>, %arg8: memref<8x4xf32, #tpu.memory_space<vmem>>, %arg9: memref<8x4xf32, #tpu.memory_space<vmem>>, %arg10: memref<1x8x16xbf16, #tpu.memory_space<vmem>>, %arg11: memref<1x8x16xbf16, #tpu.memory_space<vmem>>) attributes {dimension_semantics = [#tpu.dimension_semantics<parallel>, #tpu.dimension_semantics<parallel>], iteration_bounds = array<i64: 2, 1>, scalar_prefetch = 0 : i64, scratch_operands = 0 : i64, tpu.core_type = #tpu.core_type<tc>, window_params = [{transform_indices = @transform_0, window_bounds = array<i64: 1, 8, 64>}, {pipeline_mode = #tpu.pipeline_mode<synchronous>, transform_indices = @transform_1, window_bounds = array<i64: 1, 64>}, {pipeline_mode = #tpu.pipeline_mode<synchronous>, transform_indices = @transform_2, window_bounds = array<i64: 64, 16>}, {pipeline_mode = #tpu.pipeline_mode<synchronous>, transform_indices = @transform_3, window_bounds = array<i64: 1, 16>}, {pipeline_mode = #tpu.pipeline_mode<synchronous>, transform_indices = @transform_4, window_bounds = array<i64: 64, 16>}, {pipeline_mode = #tpu.pipeline_mode<synchronous>, transform_indices = @transform_5, window_bounds = array<i64: 1, 16>}, {transform_indices = @transform_6, window_bounds = array<i64: 8, 4>}, {transform_indices = @transform_7, window_bounds = array<i64: 8, 4>}, {transform_indices = @transform_8, window_bounds = array<i64: 1, 8, 16>}, {transform_indices = @transform_9, window_bounds = array<i64: 1, 8, 16>}]} {
    %c0 = arith.constant 0 : index
    %c0_0 = arith.constant 0 : index
    %c0_1 = arith.constant 0 : index
    %0 = vector.load %arg2[%c0, %c0_0, %c0_1] : memref<1x8x64xf32, #tpu.memory_space<vmem>>, vector<1x8x64xf32>
    %1 = vector.shape_cast %0 : vector<1x8x64xf32> to vector<8x64xf32>
    %c0_2 = arith.constant 0 : index
    %c0_3 = arith.constant 0 : index
    %2 = vector.load %arg3[%c0_2, %c0_3] : memref<1x64xf32, #tpu.memory_space<vmem>>, vector<1x64xf32>
    %3 = arith.mulf %1, %1 : vector<8x64xf32>
    %cst = arith.constant dense<0.000000e+00> : vector<8xf32>
    %4 = vector.multi_reduction <add>, %3, %cst [1] : vector<8x64xf32> to vector<8xf32>
    %5 = vector.shape_cast %4 : vector<8xf32> to vector<8x1xf32>
    %6 = math.sqrt %5 : vector<8x1xf32>
    %cst_4 = arith.constant 9.99999993E-9 : f32
    %7 = vector.broadcast %cst_4 : f32 to vector<8x1xf32>
    %8 = arith.addf %6, %7 : vector<8x1xf32>
    %9 = vector.broadcast %8 : vector<8x1xf32> to vector<8x64xf32>
    %10 = arith.divf %1, %9 : vector<8x64xf32>
    %11 = vector.broadcast %2 : vector<1x64xf32> to vector<8x64xf32>
    %12 = arith.mulf %10, %11 : vector<8x64xf32>
    %13 = arith.truncf %12 : vector<8x64xf32> to vector<8x64xbf16>
    %c0_5 = arith.constant 0 : index
    %c0_6 = arith.constant 0 : index
    %14 = vector.load %arg4[%c0_5, %c0_6] : memref<64x16xbf16, #tpu.memory_space<vmem>>, vector<64x16xbf16>
    %cst_7 = arith.constant dense<0.000000e+00> : vector<8x16xf32>
    %15 = tpu.matmul %13, %14, %cst_7 {dimension_numbers = #tpu.dot_dimension_numbers<[1], [0], [0], [1], [0, 0, 1, 1], [], []>} : vector<8x64xbf16>, vector<64x16xbf16>, vector<8x16xf32> -> vector<8x16xf32>
    %c0_8 = arith.constant 0 : index
    %c0_9 = arith.constant 0 : index
    %16 = vector.load %arg5[%c0_8, %c0_9] : memref<1x16xf32, #tpu.memory_space<vmem>>, vector<1x16xf32>
    %17 = vector.broadcast %16 : vector<1x16xf32> to vector<8x16xf32>
    %18 = arith.addf %15, %17 : vector<8x16xf32>
    %c0_10 = arith.constant 0 : index
    %c0_11 = arith.constant 0 : index
    %19 = vector.load %arg6[%c0_10, %c0_11] : memref<64x16xbf16, #tpu.memory_space<vmem>>, vector<64x16xbf16>
    %cst_12 = arith.constant dense<0.000000e+00> : vector<8x16xf32>
    %20 = tpu.matmul %13, %19, %cst_12 {dimension_numbers = #tpu.dot_dimension_numbers<[1], [0], [0], [1], [0, 0, 1, 1], [], []>} : vector<8x64xbf16>, vector<64x16xbf16>, vector<8x16xf32> -> vector<8x16xf32>
    %c0_13 = arith.constant 0 : index
    %c0_14 = arith.constant 0 : index
    %21 = vector.load %arg7[%c0_13, %c0_14] : memref<1x16xf32, #tpu.memory_space<vmem>>, vector<1x16xf32>
    %22 = vector.broadcast %21 : vector<1x16xf32> to vector<8x16xf32>
    %23 = arith.addf %20, %22 : vector<8x16xf32>
    %c0_15 = arith.constant 0 : index
    %c0_16 = arith.constant 0 : index
    %24 = vector.load %arg8[%c0_15, %c0_16] : memref<8x4xf32, #tpu.memory_space<vmem>>, vector<8x4xf32>
    %c0_17 = arith.constant 0 : index
    %c0_18 = arith.constant 0 : index
    %25 = vector.load %arg9[%c0_17, %c0_18] : memref<8x4xf32, #tpu.memory_space<vmem>>, vector<8x4xf32>
    %26 = vector.extract_strided_slice %18 {offsets = [0, 0], sizes = [8, 4], strides = [1, 1]} : vector<8x16xf32> to vector<8x4xf32>
    %27 = vector.extract_strided_slice %18 {offsets = [0, 4], sizes = [8, 4], strides = [1, 1]} : vector<8x16xf32> to vector<8x4xf32>
    %28 = arith.mulf %26, %24 : vector<8x4xf32>
    %29 = arith.mulf %27, %25 : vector<8x4xf32>
    %30 = arith.subf %28, %29 : vector<8x4xf32>
    %31 = arith.mulf %26, %25 : vector<8x4xf32>
    %32 = arith.mulf %27, %24 : vector<8x4xf32>
    %33 = arith.subf %31, %32 : vector<8x4xf32>
    %34 = vector.extract_strided_slice %18 {offsets = [0, 8], sizes = [8, 4], strides = [1, 1]} : vector<8x16xf32> to vector<8x4xf32>
    %35 = vector.extract_strided_slice %18 {offsets = [0, 12], sizes = [8, 4], strides = [1, 1]} : vector<8x16xf32> to vector<8x4xf32>
    %36 = arith.mulf %34, %24 : vector<8x4xf32>
    %37 = arith.mulf %35, %25 : vector<8x4xf32>
    %38 = arith.subf %36, %37 : vector<8x4xf32>
    %39 = arith.mulf %34, %25 : vector<8x4xf32>
    %40 = arith.mulf %35, %24 : vector<8x4xf32>
    %41 = arith.subf %39, %40 : vector<8x4xf32>
    %42 = tpu.concatenate %30, %33, %38, %41 in 1 : vector<8x4xf32>, vector<8x4xf32>, vector<8x4xf32>, vector<8x4xf32> -> vector<8x16xf32>
    %43 = arith.truncf %42 : vector<8x16xf32> to vector<8x16xbf16>
    %c0_19 = arith.constant 0 : index
    %c0_20 = arith.constant 0 : index
    %c0_21 = arith.constant 0 : index
    %44 = vector.load %arg10[%c0_19, %c0_20, %c0_21] : memref<1x8x16xbf16, #tpu.memory_space<vmem>>, vector<1x8x16xbf16>
    %45 = vector.shape_cast %44 : vector<1x8x16xbf16> to vector<8x16xbf16>
    %46 = vector.shape_cast %43 : vector<8x16xbf16> to vector<1x8x16xbf16>
    tpu.vector_store %arg10[%c0_19, %c0_20, %c0_21], %46 {strides = array<i32>} : memref<1x8x16xbf16, #tpu.memory_space<vmem>>, vector<1x8x16xbf16>,
    %47 = arith.truncf %23 : vector<8x16xf32> to vector<8x16xbf16>
    %c0_22 = arith.constant 0 : index
    %c0_23 = arith.constant 0 : index
    %c0_24 = arith.constant 0 : index
    %48 = vector.load %arg11[%c0_22, %c0_23, %c0_24] : memref<1x8x16xbf16, #tpu.memory_space<vmem>>, vector<1x8x16xbf16>
    %49 = vector.shape_cast %48 : vector<1x8x16xbf16> to vector<8x16xbf16>
    %50 = vector.shape_cast %47 : vector<8x16xbf16> to vector<1x8x16xbf16>
    tpu.vector_store %arg11[%c0_22, %c0_23, %c0_24], %50 {strides = array<i32>} : memref<1x8x16xbf16, #tpu.memory_space<vmem>>, vector<1x8x16xbf16>,
    return
  }
  func.func @transform_0(%arg0: i32, %arg1: i32) -> (i32, i32, i32) {
    %c0_i32 = arith.constant 0 : i32
    %c0_i32_0 = arith.constant 0 : i32
    return %arg0, %arg1, %c0_i32 : i32, i32, i32
  }
  func.func @transform_1(%arg0: i32, %arg1: i32) -> (i32, i32) {
    %c0_i32 = arith.constant 0 : i32
    %c0_i32_0 = arith.constant 0 : i32
    %c0_i32_1 = arith.constant 0 : i32
    return %c0_i32, %c0_i32_0 : i32, i32
  }
  func.func @transform_2(%arg0: i32, %arg1: i32) -> (i32, i32) {
    %c0_i32 = arith.constant 0 : i32
    %c0_i32_0 = arith.constant 0 : i32
    %c0_i32_1 = arith.constant 0 : i32
    return %c0_i32, %c0_i32_0 : i32, i32
  }
  func.func @transform_3(%arg0: i32, %arg1: i32) -> (i32, i32) {
    %c0_i32 = arith.constant 0 : i32
    %c0_i32_0 = arith.constant 0 : i32
    %c0_i32_1 = arith.constant 0 : i32
    return %c0_i32, %c0_i32_0 : i32, i32
  }
  func.func @transform_4(%arg0: i32, %arg1: i32) -> (i32, i32) {
    %c0_i32 = arith.constant 0 : i32
    %c0_i32_0 = arith.constant 0 : i32
    %c0_i32_1 = arith.constant 0 : i32
    return %c0_i32, %c0_i32_0 : i32, i32
  }
  func.func @transform_5(%arg0: i32, %arg1: i32) -> (i32, i32) {
    %c0_i32 = arith.constant 0 : i32
    %c0_i32_0 = arith.constant 0 : i32
    %c0_i32_1 = arith.constant 0 : i32
    return %c0_i32, %c0_i32_0 : i32, i32
  }
  func.func @transform_6(%arg0: i32, %arg1: i32) -> (i32, i32) {
    %c0_i32 = arith.constant 0 : i32
    %c0_i32_0 = arith.constant 0 : i32
    return %arg1, %c0_i32 : i32, i32
  }
  func.func @transform_7(%arg0: i32, %arg1: i32) -> (i32, i32) {
    %c0_i32 = arith.constant 0 : i32
    %c0_i32_0 = arith.constant 0 : i32
    return %arg1, %c0_i32 : i32, i32
  }
  func.func @transform_8(%arg0: i32, %arg1: i32) -> (i32, i32, i32) {
    %c0_i32 = arith.constant 0 : i32
    %c0_i32_0 = arith.constant 0 : i32
    return %arg0, %arg1, %c0_i32 : i32, i32, i32
  }
  func.func @transform_9(%arg0: i32, %arg1: i32) -> (i32, i32, i32) {
    %c0_i32 = arith.constant 0 : i32
    %c0_i32_0 = arith.constant 0 : i32
    return %arg0, %arg1, %c0_i32 : i32, i32, i32
  }
}

</mosaic_0001>

<bundles_post_ra>
// kernel: tpu_custom_call.1
= control target key start
LH: loop header
LB: loop body
LE: loop exit
PB: predicated region body
PF: predicated region fallthrough
CT: control target
= control target key end

     0   :  { %s1348_s0 = inlined_call_operand.vmem [shape: f32[2,8,64], index: 0, kind: input, shape index: {}]   ;;  %s1349_s1 = inlined_call_operand.vmem [shape: f32[1,64], index: 1, kind: input, shape index: {}]   ;;  %s1350_s2 = inlined_call_operand.vmem [shape: bf16[64,16], index: 2, kind: input, shape index: {}]   ;;  %s1351_s3 = inlined_call_operand.vmem [shape: f32[1,16], index: 3, kind: input, shape index: {}]   ;;  %s1352_s4 = inlined_call_operand.vmem [shape: bf16[64,16], index: 4, kind: input, shape index: {}]   ;;  %s1353_s5 = inlined_call_operand.vmem [shape: f32[1,16], index: 5, kind: input, shape index: {}]   ;;  %s1354_s6 = inlined_call_operand.vmem [shape: f32[8,4], index: 6, kind: input, shape index: {}]   ;;  %s1355_s7 = inlined_call_operand.vmem [shape: f32[8,4], index: 7, kind: input, shape index: {}]   ;;  %s1356_s8 = inlined_call_operand.hbm [shape: bf16[2,8,16], index: 8, kind: output, shape index: {0}]   ;;  %s1357_s9 = inlined_call_operand.hbm [shape: bf16[2,8,16], index: 9, kind: output, shape index: {1}]  }
   0x1   :  { %1362 = sst [smem:[#allocation8_spill]] %s1348_s0 }
   0x2   :  { %15 = vsyncpa [#allocation3], 0 }
   0x3   :  { %17 = vsyncpa [#allocation3 + $0x1], 0 }
   0x4   :  { %18 = vsyncpa [#allocation5], 0 }
   0x5   :  { %20 = vsyncpa [#allocation5 + $0x1], 0  ;;  %s1135_s30 = smov 0   ;;  %s1137_s10 = smov 0  }
   0x6   :  { %s1139_s11 = smov 0   ;;  %s1141_s12 = smov 0  }
   0x7   :  { %s1143_s13 = smov 0   ;;  %s1145_s14 = smov 0  }
   0x8 LB: > { %s824_s15 = sadd.s32 4294967295, %s1075_s14   ;;  %s825_s16 = sadd.s32 4294967294, %s1075_s14   ;;  %s1075_s14 = sphi %s1145_s14, %s26_s14   ;;  %s1071_s13 = sphi %s1143_s13, %s1373_s13   ;;  %s1067_s12 = sphi %s1141_s12, %s1372_s12   ;;  %s1063_s11 = sphi %s1139_s11, %s1371_s11   ;;  %s1059_s10 = sphi %s1137_s10, %s1370_s10   ;;  %s1055_s30 = sphi %s1135_s30, %s1369_s30  }
   0x9   : > { %s38_s17 = sadd.s32 1, %s1071_s13  ;;  %s232_s18 = sadd.s32 1, %s1063_s11 }
   0xa   : > { %p40_p0 = scmp.ge.s32.totalorder %s38_s17, 2  ;;  %p242_p1 = scmp.ne.s32.totalorder %s1063_s11, %s1059_s10 }
   0xb   : > { %p243_p2 = scmp.eq.s32.totalorder %s824_s15, 1  ;;  %p248_p3 = scmp.ne.s32.totalorder %s1059_s10, %s1055_s30 }
   0xc   : > { %s1375_s17 = smov (%p40_p0, %s38_s17), 0  ;;  %p249_p5 = scmp.eq.s32.totalorder %s825_s16, 1 }
   0xd   : > { %p1175_p4 = por %p243_p2, %p242_p1  ;;  %s227_s20 = ssub.s32 %s1071_s13, %s1375_s17 }
   0xe   : > { %p830_p6 = scmp.ge.s32.totalorder %s1075_s14, 1  ;;  %p230_p7 = scmp.eq.s32.totalorder %s227_s20, 0 }
   0xf   : > { %p1182_p8 = por %p249_p5, %p248_p3  ;;  %p334_p9 = scmp.lt.s32.totalorder %s1075_s14, 3 }
  0x10   : > { %s1188_s22 = scalar_select %p230_p7, %s1063_s11, %s232_s18  }
  0x11   : > { %p335_p10 = pnand %p830_p6, %p334_p9 }
  0x12   : > { %p385_p11 = scmp.lt.s32.totalorder (!%p335_p10), %s1067_s12, 1  ;;  %s1365_s0 = sld [smem:[#allocation8_spill]] (!%p335_p10)  ;;  %vm404_vm0 = vcmask (!%p335_p10), 523264   ;;  %v953_v3 = vld [vmem:[%s1350_s2] sm:$0xff] (!%p335_p10)   ;;  %v1077_v5 = vmov (!%p335_p10), 0.0   ;;  %v955_v6 = vld [vmem:[%s1350_s2 + $0x8] sm:$0xff] (!%p335_p10)  }
  0x13   : > { %338 = sbr.rel (%p335_p10) target bundleno = 690 (0x2b2), region = 52  ;;  %v954_v4 = vld [vmem:[%s1352_s4] sm:$0xff] (!%p335_p10)   ;;  %863 = vmatprep.subr.bf16.mxu0 (!%p335_p10), %v1077_v5  ;;  %875 = vmatprep.subr.bf16.mxu1 (!%p335_p10), %v1077_v5  ;;  %v956_v7 = vld [vmem:[%s1352_s4 + $0x8] sm:$0xff] (!%p335_p10)   ;;  %vm1078_vm1 = vmmov (!%p335_p10), 0   ;;  %v957_v8 = vld [vmem:[%s1350_s2 + $0x10] sm:$0xff] (!%p335_p10)   ;;  %s1359_s25 = smov (!%p335_p10), 4  }
  0x14   : > { %864 = vmatpush3.bf16.msra.mxu0 (!%p335_p10), %v953_v3  ;;  %876 = vmatpush3.bf16.msra.mxu1 (!%p335_p10), %v954_v4  ;;  %v958_v9 = vld [vmem:[%s1352_s4 + $0x10] sm:$0xff] (!%p335_p10)   ;;  %v959_v10 = vld [vmem:[%s1350_s2 + $0x18] sm:$0xff] (!%p335_p10)   ;;  %v1223_v12 = vld [vmem:[%s1354_s6] sm:$0xff] (!%p335_p10)  ;;  %s1081_s28 = smov (!%p335_p10), 8   ;;  %s1239_s16 = sand.u32 (!%p335_p10), 1, %s1059_s10   ;;  %vm652_vm4 = vcmask (!%p335_p10), 125952  }
  0x15   : > { %865 = vmatprep.subr.bf16.mxu0 (!%p335_p10), %v1077_v5  ;;  %877 = vmatprep.subr.bf16.mxu1 (!%p335_p10), %v1077_v5  ;;  %v960_v11 = vld [vmem:[%s1352_s4 + $0x18] sm:$0xff] (!%p335_p10)   ;;  %v588_v13 = vld [vmem:[%s1355_s7] sm:$0xff] (!%p335_p10)  ;;  %s1358_s26 = sshll.u32 (!%p335_p10), %s1239_s16, 2  ;;  %s1361_s15 = sshll.u32 (!%p335_p10), %s1067_s12, 6 }
  0x16   : > { %871 = vmatprep.mubr.msk.bf16.mxu0 (!%p335_p10), %vm1078_vm1, %v1077_v5  ;;  %883 = vmatprep.mubr.msk.bf16.mxu1 (!%p335_p10), %vm1078_vm1, %v1077_v5  ;;  %v834_v22 = vld [vmem:[%s1349_s1] ss:$0 sm:$0xff] (!%p335_p10)  ;;  %s384_s29 = scalar_lea.vmem (!%p335_p10), [#allocation4], %s1358_s26  ;;  %s662_s26 = scalar_lea.sflag (!%p335_p10), [#allocation5], %s1239_s16 }
  0x17   : > { %v835_v27 = vld [vmem:[%s1351_s3] ss:$0 sm:$0xff] (!%p335_p10) }
  0x18   : > { %866 = vmatpush3.bf16.msra.mxu0 (!%p335_p10), %v955_v6  ;;  %878 = vmatpush3.bf16.msra.mxu1 (!%p335_p10), %v956_v7  ;;  %v841_v28 = vld [vmem:[%s1353_s5] ss:$0 sm:$0xff] (!%p335_p10) }
  0x19   : > { %867 = vmatprep.subr.bf16.mxu0 (!%p335_p10), %v1077_v5  ;;  %879 = vmatprep.subr.bf16.mxu1 (!%p335_p10), %v1077_v5 }
  0x1a   : > { %s386_s23 = scalar_select %p385_p11, %s1067_s12, 1 }
  0x1c   : > { %s833_s24 = sshll.u32 %s386_s23, 3  ;;  %868 = vmatpush3.bf16.msra.mxu0 %v957_v8  ;;  %880 = vmatpush3.bf16.msra.mxu1 %v958_v9  ;;  %s1266_s23 = scalar_lea.hbm %s1357_s9, %s1361_s15 }
  0x1d   : > { %s391_s27 = scalar_lea.vmem %s1365_s0, %s833_s24  ;;  %869 = vmatprep.subr.bf16.mxu0 %v1077_v5  ;;  %881 = vmatprep.subr.bf16.mxu1 %v1077_v5  ;;  %s1079_s24 = smov 12  }
  0x1e   : > { %v401_v0 = vld [vmem:[%s391_s27] sm:$0xff]  ;;  %628 = vrot.lane.b32.xlu1 %v1223_v12, %s1079_s24  ;;  %s1082_s27 = smov 124  }
  0x1f   : > { %v403_v1 = vmul.f32 %v401_v0, %v401_v0 }
  0x20   : > { %870 = vmatpush3.bf16.msra.mxu0 %v959_v10  ;;  %882 = vmatpush3.bf16.msra.mxu1 %v960_v11 }
  0x21   : > { %v405_v2 = vsel %vm404_vm0, %v403_v1, 0.0 }
  0x22   : > { %406 = vadd.xlane.f32.xlu0 %v405_v2  ;;  %591 = vrot.lane.b32.xlu1 %v588_v13, %s1359_s25 }
  0x26   : > { %615 = vrot.lane.b32.xlu1 %v588_v13, %s1079_s24  ;;  %s690_s24 = sshll.u32 %s384_s29, 4  ;;  %s691_s24 = int_to_ptr.vmem [resolvable:$true] %s690_s24 }
  0x2a   : > { %624 = vrot.lane.b32.xlu1 %v588_v13, %s1081_s28 }
  0x38   : > { %602 = vrot.lane.b32.xlu0 %v1223_v12, %s1359_s25 }
  0x90   : > { %v629_v26 = vpop.permute.xlu1 %628 }
  0x94   : > { %v592_v29 = vpop.permute.xlu1 %591 }
  0x98   : > { %v616_v45 = vpop.permute.xlu1 %615 }
  0x9c   : > { %v625_v47 = vpop.permute.xlu1 %624 }
  0xaf   : > { %v407_v14 = vpop.xlane.xlu0 %406 }
  0xb0   : > { %961 = vrsqrt.f32 %v407_v14  ;;  %vm410_vm2 = vcmp.eq.f32.partialorder %v407_v14, inf  ;;  %v413_v17 = vand.u32 2147483648, %v407_v14  ;;  %vm412_vm3 = vcmp.eq.f32.partialorder %v407_v14, 0.0 }
  0xb3   : > { %v603_v30 = vpop.permute.xlu0 %602 }
  0xba   : > { %v962_v15 = vpop.eup %961 }
  0xbb   : > { %v409_v16 = vmul.f32 %v962_v15, %v407_v14 }
  0xbd   : > { %v411_v18 = vsel %vm410_vm2, %v407_v14, %v409_v16 }
  0xbe   : > { %v414_v19 = vsel %vm412_vm3, %v413_v17, %v411_v18 }
  0xbf   : > { %v415_v20 = vadd.f32 1e-08, %v414_v19 }
  0xc1   : > { %963 = vrcp.f32 %v415_v20 }
  0xcb   : > { %v964_v21 = vpop.eup %963 }
  0xcc   : > { %v417_v23 = vmul.f32 %v964_v21, %v401_v0 }
  0xce   : > { %v424_v24 = vmul.f32 %v834_v22, %v417_v23 }
  0xd0   : > { %v425_v25 = vpack.c.bf16 %v424_v24, %v424_v24 }
  0xd2   : > { %872 = vmatmul.mubr.msk.bf16.vlgmr.msra.gmra.mrb[0].mxu0 %vm404_vm0, %v425_v25  ;;  %884 = vmatmul.mubr.msk.bf16.vlgmr.msra.gmra.mrb[0].mxu1 %vm404_vm0, %v425_v25 }
 0x1a5   : > { %v502_v31 = vpop.f32.mrb[0].mxu0  ;;  %v581_v32 = vpop.f32.mrb[0].mxu1 }
 0x1a6   : > { %v1248_v33 = vadd.f32 %v835_v27, %v502_v31  ;;  %v582_v34 = vadd.f32 %v841_v28, %v581_v32  ;;  %v873_v35 = vpop.f32.mrb[1].mxu0  ;;  %v885_v36 = vpop.f32.mrb[1].mxu1 }
 0x1a7   : > { %v505_v37 = vpop.f32.mrb[2].mxu0  ;;  %v584_v38 = vpop.f32.mrb[2].mxu1 }
 0x1a8   : > { %v654_v39 = vpack.c.bf16 %v582_v34, %v582_v34  ;;  %v605_v40 = vmul.f32 %v603_v30, %v1248_v33  ;;  %v874_v41 = vpop.f32.mrb[3].mxu0  ;;  %v886_v42 = vpop.f32.mrb[3].mxu1  ;;  %v594_v43 = vmul.f32 %v592_v29, %v1248_v33  ;;  %v631_v44 = vmul.f32 %v629_v26, %v1248_v33 }
 0x1a9   : > { %v618_v46 = vmul.f32 %v616_v45, %v1248_v33  ;;  %v600_v48 = vmul.f32 %v588_v13, %v1248_v33 }
 0x1aa   : > { %596 = vrot.lane.b32.xlu0 %v594_v43, %s1082_s27  ;;  %607 = vrot.lane.b32.xlu1 %v605_v40, %s1082_s27  ;;  %655 = vst.msk [vmem:[%s384_s29] sm:$0xf] %vm652_vm4, %v654_v39 }
 0x1ae   : > { %633 = vrot.lane.b32.xlu1 %v631_v44, %s1082_s27 }
 0x1b2   : > { %611 = vrot.lane.b32.xlu1 %v1223_v12, %s1081_s28  ;;  %s965_s28 = scalar_lea.vmem %s691_s24, 64 }
 0x1b3   : > { %p966_p12 = scmp.ne.s32.totalorder %s691_s24, %s965_s28 }
 0x1b5   : > { %p967_p13 = pnand %p966_p12, %p1175_p4 }
 0x1b6   : > { %620 = vrot.lane.b32.xlu1 %v618_v46, %s1082_s27  ;;  %s1083_s27 = smov [#allocation4]  }
 0x1b7   : > { %p968_p0 = pneg %p967_p13  ;;  %s969_s25 = sshll.u32 %s1083_s27, 4  ;;  %s970_s25 = int_to_ptr.vmem [resolvable:$false] %s969_s25 }
 0x1b8   : > { %s971_s0 = scalar_lea.vmem %s970_s25, 128  ;;  %p972_p1 = scmp.lt.s32.totalorder %s691_s24, %s970_s25 }
 0x1b9   : > { %p973_p2 = scmp.lt.s32.totalorder %s971_s0, %s965_s28 }
 0x1bb   : > { %p974_p3 = por %p973_p2, %p972_p1 }
 0x1bd   : > { %p975_p5 = pnand %p974_p3, %p968_p0 }
 0x21c   : > { %v608_v49 = vpop.permute.xlu1 %607 }
 0x21d   : > { %v610_v50 = vsub.f32 %v600_v48, %v608_v49 }
 0x21e   : > { %978 = shalt.err (!%p975_p5)
}
 0x21f   : > { %s979_s29 = scalar_lea.hbm %s1266_s23, 64  ;;  %s983_s27 = scalar_lea.hbm %s1357_s9, 128 }
 0x220   : > { %p980_p6 = scmp.ne.s32.totalorder %s1266_s23, %s979_s29  ;;  %p984_p10 = scmp.lt.u32.totalorder %s1266_s23, %s1357_s9 }
 0x221   : > { %p985_p11 = scmp.lt.u32.totalorder %s983_s27, %s979_s29  ;;  %p987_p13 = scmp.lt.u32.totalorder %s979_s29, %s1266_s23 }
 0x222   : > { %p981_p7 = pnand %p980_p6, %p1175_p4 }
 0x223   : > { %p986_p12 = por %p985_p11, %p984_p10 }
 0x224   : > { %p982_p9 = pneg %p981_p7 }
 0x225   : > { %p988_p0 = por %p987_p13, %p986_p12 }
 0x227   : > { %p989_p1 = pnand %p988_p0, %p982_p9 }
 0x229   : > { %992 = shalt.err (!%p989_p1)
}
 0x22a   : > { %888 = dma.vmem_to_hbm [thread:$0]  (%p1175_p4), %s691_s24, 64, %s1266_s23, %s662_s26   ;;  %v627_v51 = vmul.f32 %v625_v47, %v1248_v33  ;;  %v634_v52 = vpop.permute.xlu1 %633  ;;  %v597_v55 = vpop.permute.xlu0 %596  ;;  %v589_v56 = vmul.f32 %v1223_v12, %v1248_v33  ;;  %vm645_vm5 = vcmask 31744   ;;  %vm647_vm6 = vcmask 64512  }
 0x22b   : > { %s1366_s0 = smov 4   ;;  %vm649_vm7 = vcmask 97280   ;;  %s1367_s26 = sshll.u32 %s1239_s16, 2 }
 0x22c   : > { %638 = vrot.lane.b32.xlu0 %v610_v50, %s1366_s0  ;;  %v636_v53 = vsub.f32 %v627_v51, %v634_v52  ;;  %v599_v57 = vsub.f32 %v589_v56, %v597_v55  ;;  %s377_s15 = scalar_lea.vmem [#allocation2], %s1367_s26  ;;  %s1368_s24 = sshll.u32 %s1067_s12, 6 }
 0x22d   : > { %s676_s23 = sshll.u32 %s377_s15, 4  ;;  %s1299_s18 = scalar_lea.hbm %s1356_s8, %s1368_s24  ;;  %s1301_s23 = int_to_ptr.vmem [resolvable:$true] %s676_s23 }
 0x22e   : > { %642 = vrot.lane.b32.xlu1 %v636_v53, %s1366_s0  ;;  %v612_v54 = vpop.permute.xlu1 %611  ;;  %s657_s20 = scalar_lea.sflag [#allocation3], %s1239_s16  ;;  %s993_s27 = scalar_lea.vmem %s1301_s23, 64 }
 0x22f   : > { %v614_v59 = vmul.f32 %v612_v54, %v1248_v33  ;;  %p994_p2 = scmp.ne.s32.totalorder %s1301_s23, %s993_s27  ;;  %s1084_s25 = smov [#allocation2]  }
 0x230   : > { %s997_s12 = sshll.u32 %s1084_s25, 4  ;;  %s998_s12 = int_to_ptr.vmem [resolvable:$false] %s997_s12 }
 0x231   : > { %p995_p3 = pnand %p994_p2, %p1175_p4  ;;  %s999_s0 = scalar_lea.vmem %s998_s12, 128 }
 0x232   : > { %v621_v58 = vpop.permute.xlu1 %620  ;;  %p1000_p6 = scmp.lt.s32.totalorder %s1301_s23, %s998_s12  ;;  %p1001_p7 = scmp.lt.s32.totalorder %s999_s0, %s993_s27 }
 0x233   : > { %v623_v62 = vsub.f32 %v614_v59, %v621_v58  ;;  %p996_p5 = pneg %p995_p3 }
 0x234   : > { %p1002_p9 = por %p1001_p7, %p1000_p6 }
 0x236   : > { %p1003_p10 = pnand %p1002_p9, %p996_p5 }
 0x29e   : > { %v639_v60 = vpop.permute.xlu0 %638 }
 0x29f   : > { %v646_v61 = vsel %vm645_vm5, %v599_v57, %v639_v60 }
 0x2a0   : > { %v643_v63 = vpop.permute.xlu1 %642  ;;  %v648_v0 = vsel %vm647_vm6, %v646_v61, %v623_v62 }
 0x2a1   : > { %v650_v1 = vsel %vm649_vm7, %v648_v0, %v643_v63 }
 0x2a2   : > { %v651_v2 = vpack.c.bf16 %v650_v1, %v650_v1 }
 0x2a4   : > { %653 = vst.msk [vmem:[%s377_s15] sm:$0xf] %vm652_vm4, %v651_v2 }
 0x2a5   : > { %1006 = shalt.err (!%p1003_p10)
}
 0x2a6   : > { %s1007_s16 = scalar_lea.hbm %s1299_s18, 64  ;;  %s1011_s24 = scalar_lea.hbm %s1356_s8, 128 }
 0x2a7   : > { %p1008_p11 = scmp.ne.s32.totalorder %s1299_s18, %s1007_s16  ;;  %p1012_p0 = scmp.lt.u32.totalorder %s1299_s18, %s1356_s8 }
 0x2a8   : > { %p1013_p1 = scmp.lt.u32.totalorder %s1011_s24, %s1007_s16  ;;  %p1015_p3 = scmp.lt.u32.totalorder %s1007_s16, %s1299_s18 }
 0x2a9   : > { %p1009_p12 = pnand %p1008_p11, %p1175_p4 }
 0x2aa   : > { %p1014_p2 = por %p1013_p1, %p1012_p0 }
 0x2ab   : > { %p1010_p13 = pneg %p1009_p12 }
 0x2ac   : > { %p1016_p5 = por %p1015_p3, %p1014_p2 }
 0x2ae   : > { %p1017_p6 = pnand %p1016_p5, %p1010_p13 }
 0x2b0   : > { %1020 = shalt.err (!%p1017_p6)
}
 0x2b1   : > { %887 = dma.vmem_to_hbm [thread:$0]  (%p1175_p4), %s1301_s23, 64, %s1299_s18, %s657_s20  }
 0x2b2 PF: > { %p898_p7 = scmp.ge.s32.totalorder %s1075_s14, 2  ;;  %s702_s27 = sand.u32 1, %s1055_s30  }
 0x2b3   : > { %s703_s25 = scalar_lea.sflag [#allocation3], %s702_s27 }
 0x2b4   : > { %p892_p9 = pnand %p898_p7, %p1182_p8 }
 0x2b6   : > { %1046 = dma.done.wait (!%p892_p9), %s703_s25, 64  }
 0x2b7   : > { %1048 = vsyncadd (!%p892_p9), %s703_s25, 4294967232  ;;  %s712_s12 = scalar_lea.sflag [#allocation5], %s702_s27 }
 0x2b8   : > { %1050 = dma.done.wait (!%p892_p9), %s712_s12, 64  }
 0x2b9   : > { %1052 = vsyncadd (!%p892_p9), %s712_s12, 4294967232  ;;  %s26_s14 = sadd.s32 1, %s1075_s14   ;;  %s1369_s30 = smov %s1059_s10 }
 0x2ba   : > { %p23_p10 = scmp.ge.s32.totalorder %s26_s14, 4   ;;  %s1370_s10 = smov %s1063_s11 }
 0x2bb   : > { %s1371_s11 = smov %s1188_s22  ;;  %s1372_s12 = smov %s1071_s13 }
 0x2bc   : > { %s1373_s13 = smov %s1375_s17  ;;  %25 = sbr.rel (!%p23_p10) target bundleno = 8 (0x8), region = 110 }
 0x2c3   :  { %717 = vsyncpa [#allocation3], 1 }
 0x2c4   :  { %719 = vsyncpa [#allocation3 + $0x1], 1 }
 0x2c5   :  { %720 = vsyncpa [#allocation5], 1 }
 0x2c6   :  { %722 = vsyncpa [#allocation5 + $0x1], 1 }

</bundles_post_ra>
